<compile_context>
chip_gen: v7x
topology: tpu7x:2x2x1
jax: 0.10.0
libtpu: 0.0.40
codegen_flags: <defaults>
</compile_context>

<pallas_src>
import jax
import jax.numpy as jnp
from jax.experimental import pallas as pl
from jax.experimental.pallas import tpu as pltpu


def _round_up(x: int, m: int) -> int:
    return (x + m - 1) // m * m


def _critic_kernel(x_ref, w1_ref, b1_ref, w2_ref, b2_ref, w3_ref, b3_ref, o_ref):
    # x tile: (TBq, P*D) f32 in VMEM; cast to bf16 for single-pass MXU matmuls.
    x = x_ref[...].astype(jnp.bfloat16)

    # Packed layer 1: (TBq, P*D) @ (P*D, P*20) block-diagonal, f32 accumulate.
    h1 = jnp.dot(x, w1_ref[...], preferred_element_type=jnp.float32) + b1_ref[...]
    h1 = jnp.maximum(h1, 0.0)

    # Packed layer 2: (TBq, P*20) @ (P*20, P*10).
    h2 = jnp.dot(h1.astype(jnp.bfloat16), w2_ref[...],
                 preferred_element_type=jnp.float32) + b2_ref[...]
    h2 = jnp.maximum(h2, 0.0)

    # Packed layer 3: (TBq, P*10) @ (P*10, P) block "selection" matmul.
    out = jnp.dot(h2.astype(jnp.bfloat16), w3_ref[...],
                  preferred_element_type=jnp.float32) + b3_ref[...]
    o_ref[...] = out.astype(o_ref.dtype)


def critic_forward(x, params, *, block_rows: int = 16384):
    """x: (batch, input_size) f32. params: dict with w1,b1,w2,b2,w3,b3 ((in,out) weights)."""
    w1, b1 = params["w1"], params["b1"]
    w2, b2 = params["w2"], params["b2"]
    w3, b3 = params["w3"], params["b3"]

    B, D = x.shape
    H1, H2 = w1.shape[1], w2.shape[1]           # 20, 10

    # Pack P consecutive rows into one lane-row (P*D <= 128 lanes -> dense vregs).
    P = max(1, 128 // D)
    PD, PH1 = P * D, P * H1

    # Block-diagonal packed weights (bf16) + tiled biases (f32). Tiny & resident.
    eye = jnp.eye(P, dtype=jnp.float32)
    w1p = jnp.kron(eye, w1).astype(jnp.bfloat16)     # (P*D,  P*H1)
    w2p = jnp.kron(eye, w2).astype(jnp.bfloat16)     # (P*H1, P*H2)
    w3p = jnp.kron(eye, w3).astype(jnp.bfloat16)     # (P*H2, P)
    b1p = jnp.tile(b1, (1, P)).astype(jnp.float32)   # (1, P*H1)
    b2p = jnp.tile(b2, (1, P)).astype(jnp.float32)   # (1, P*H2)
    b3p = jnp.tile(b3, (1, P)).astype(jnp.float32)   # (1, P)

    # Pad batch to a multiple of P and pack P rows -> one lane-dense row.
    Bp = _round_up(B, P)
    if Bp != B:
        x = jnp.pad(x, ((0, Bp - B), (0, 0)))
    Bq = Bp // P
    xq = x.reshape(Bq, PD)                            # contiguous rows -> free reshape

    # Packed-row tile: multiple of 8 (sublanes), capped at the packed batch.
    TBq = max(8, min(_round_up(max(1, block_rows // P), 8), _round_up(Bq, 8)))
    Bqp = _round_up(Bq, TBq)
    if Bqp != Bq:
        xq = jnp.pad(xq, ((0, Bqp - Bq), (0, 0)))

    grid = (Bqp // TBq,)

    # Constant index_map: same block every step -> fetched once, stays resident.
    def const_spec(a):
        return pl.BlockSpec(a.shape, lambda i: (0,) * a.ndim)

    cost = pl.CostEstimate(
        flops=2 * Bp * (D * H1 + H1 * H2 + H2 * 1),
        transcendentals=0,
        bytes_accessed=(Bqp * PD + Bqp * P) * 4
        + 2 * (w1p.size + w2p.size + w3p.size)
        + 4 * (b1p.size + b2p.size + b3p.size),
    )

    out = pl.pallas_call(
        _critic_kernel,
        out_shape=jax.ShapeDtypeStruct((Bqp, P), jnp.float32),
        grid=grid,
        in_specs=[
            pl.BlockSpec((TBq, PD), lambda i: (i, 0)),   # packed x: tiled over batch
            const_spec(w1p), const_spec(b1p),
            const_spec(w2p), const_spec(b2p),
            const_spec(w3p), const_spec(b3p),
        ],
        out_specs=pl.BlockSpec((TBq, P), lambda i: (i, 0)),
        compiler_params=pltpu.CompilerParams(
            dimension_semantics=("parallel",),            # megacore split on v7x
        ),
        cost_estimate=cost,
    )(xq, w1p, b1p, w2p, b2p, w3p, b3p)

    # Unpack: (Bqp, P) -> drop packed-row padding -> (Bp, 1) -> drop row padding.
    return out[:Bq].reshape(Bp, 1)[:B]


def xavier_uniform(key, fan_in, fan_out, dtype=jnp.float32):
    # matches nn.init.xavier_uniform_ (gain=1): U(-a, a), a = sqrt(6/(fan_in+fan_out))
    a = jnp.sqrt(6.0 / (fan_in + fan_out))
    # PyTorch weight is (out, in); sample in that shape then transpose so the
    # distribution/fan semantics match, storing (in, out) for the kernel.
    w = jax.random.uniform(key, (fan_out, fan_in), dtype=dtype, minval=-a, maxval=a)
    return w.T


def init_critic_params(key, input_size):
    k1, k2, k3 = jax.random.split(key, 3)
    return {
        "w1": xavier_uniform(k1, input_size, 20),
        "b1": jnp.zeros((1, 20), jnp.float32),
        "w2": xavier_uniform(k2, 20, 10),
        "b2": jnp.zeros((1, 10), jnp.float32),
        "w3": xavier_uniform(k3, 10, 1),
        "b3": jnp.zeros((1, 1), jnp.float32),
    }


def _reference_f32(x, params):
    h1 = jnp.maximum(x @ params["w1"] + params["b1"], 0.0)
    h2 = jnp.maximum(h1 @ params["w2"] + params["b2"], 0.0)
    return h2 @ params["w3"] + params["b3"]


def _reference_bf16(x, params):
    # Same numerics as the kernel: bf16 operands, f32 accumulation on the MXU.
    bf = jnp.bfloat16
    h1 = jnp.maximum(jnp.dot(x.astype(bf), params["w1"].astype(bf),
                             preferred_element_type=jnp.float32) + params["b1"], 0.0)
    h2 = jnp.maximum(jnp.dot(h1.astype(bf), params["w2"].astype(bf),
                             preferred_element_type=jnp.float32) + params["b2"], 0.0)
    return jnp.dot(h2.astype(bf), params["w3"].astype(bf),
                   preferred_element_type=jnp.float32) + params["b3"]


if __name__ == "__main__":
    key = jax.random.PRNGKey(0)
    k_param, k_x = jax.random.split(key)

    batch, input_size = 200, 32          # non-multiple-of-tile batch exercises padding
    params = init_critic_params(k_param, input_size)
    x = jax.random.normal(k_x, (batch, input_size), dtype=jnp.float32)

    ref_bf16 = _reference_bf16(x, params)
    ref_f32 = _reference_f32(x, params)

    # Small tile -> multi-step grid (exercises pipelining, padding, resident weights).
    out_tiled = jax.block_until_ready(critic_forward(x, params, block_rows=64))
    assert out_tiled.shape == (batch, 1)
    assert jnp.allclose(out_tiled, ref_bf16, atol=1e-3, rtol=1e-3)

    # Default (large) tile -> single-step grid path.
    out_default = jax.block_until_ready(critic_forward(x, params))
    assert out_default.shape == (batch, 1)
    assert jnp.allclose(out_default, ref_bf16, atol=1e-3, rtol=1e-3)
    # Loose check vs. full-f32 reference (bf16 operand rounding only).
    assert float(jnp.max(jnp.abs(out_default - ref_f32))) < 0.1

    print("KERNEL_OK")
</pallas_src>

<mosaic_0001>
module attributes {stable_mosaic.version = 11 : i64} {
  func.func @_critic_kernel(%arg0: i32, %arg1: memref<16x128xf32, #tpu.memory_space<vmem>>, %arg2: memref<128x80xbf16, #tpu.memory_space<vmem>>, %arg3: memref<1x80xf32, #tpu.memory_space<vmem>>, %arg4: memref<80x40xbf16, #tpu.memory_space<vmem>>, %arg5: memref<1x40xf32, #tpu.memory_space<vmem>>, %arg6: memref<40x4xbf16, #tpu.memory_space<vmem>>, %arg7: memref<1x4xf32, #tpu.memory_space<vmem>>, %arg8: memref<16x4xf32, #tpu.memory_space<vmem>>) attributes {dimension_semantics = [#tpu.dimension_semantics<parallel>], iteration_bounds = array<i64: 4>, scalar_prefetch = 0 : i64, scratch_operands = 0 : i64, tpu.core_type = #tpu.core_type<tc>, window_params = [{transform_indices = @transform_0, window_bounds = array<i64: 16, 128>}, {pipeline_mode = #tpu.pipeline_mode<synchronous>, transform_indices = @transform_1, window_bounds = array<i64: 128, 80>}, {pipeline_mode = #tpu.pipeline_mode<synchronous>, transform_indices = @transform_2, window_bounds = array<i64: 1, 80>}, {pipeline_mode = #tpu.pipeline_mode<synchronous>, transform_indices = @transform_3, window_bounds = array<i64: 80, 40>}, {pipeline_mode = #tpu.pipeline_mode<synchronous>, transform_indices = @transform_4, window_bounds = array<i64: 1, 40>}, {pipeline_mode = #tpu.pipeline_mode<synchronous>, transform_indices = @transform_5, window_bounds = array<i64: 40, 4>}, {pipeline_mode = #tpu.pipeline_mode<synchronous>, transform_indices = @transform_6, window_bounds = array<i64: 1, 4>}, {transform_indices = @transform_7, window_bounds = array<i64: 16, 4>}]} {
    %c0 = arith.constant 0 : index
    %c0_0 = arith.constant 0 : index
    %0 = vector.load %arg1[%c0, %c0_0] : memref<16x128xf32, #tpu.memory_space<vmem>>, vector<16x128xf32>
    %1 = arith.truncf %0 : vector<16x128xf32> to vector<16x128xbf16>
    %c0_1 = arith.constant 0 : index
    %c0_2 = arith.constant 0 : index
    %2 = vector.load %arg2[%c0_1, %c0_2] : memref<128x80xbf16, #tpu.memory_space<vmem>>, vector<128x80xbf16>
    %cst = arith.constant dense<0.000000e+00> : vector<16x80xf32>
    %3 = tpu.matmul %1, %2, %cst {dimension_numbers = #tpu.dot_dimension_numbers<[1], [0], [0], [1], [0, 0, 1, 1], [], []>} : vector<16x128xbf16>, vector<128x80xbf16>, vector<16x80xf32> -> vector<16x80xf32>
    %c0_3 = arith.constant 0 : index
    %c0_4 = arith.constant 0 : index
    %4 = vector.load %arg3[%c0_3, %c0_4] : memref<1x80xf32, #tpu.memory_space<vmem>>, vector<1x80xf32>
    %5 = vector.broadcast %4 : vector<1x80xf32> to vector<16x80xf32>
    %6 = arith.addf %3, %5 : vector<16x80xf32>
    %cst_5 = arith.constant 0.000000e+00 : f32
    %7 = vector.broadcast %cst_5 : f32 to vector<16x80xf32>
    %8 = arith.maximumf %6, %7 : vector<16x80xf32>
    %9 = arith.truncf %8 : vector<16x80xf32> to vector<16x80xbf16>
    %c0_6 = arith.constant 0 : index
    %c0_7 = arith.constant 0 : index
    %10 = vector.load %arg4[%c0_6, %c0_7] : memref<80x40xbf16, #tpu.memory_space<vmem>>, vector<80x40xbf16>
    %cst_8 = arith.constant dense<0.000000e+00> : vector<16x40xf32>
    %11 = tpu.matmul %9, %10, %cst_8 {dimension_numbers = #tpu.dot_dimension_numbers<[1], [0], [0], [1], [0, 0, 1, 1], [], []>} : vector<16x80xbf16>, vector<80x40xbf16>, vector<16x40xf32> -> vector<16x40xf32>
    %c0_9 = arith.constant 0 : index
    %c0_10 = arith.constant 0 : index
    %12 = vector.load %arg5[%c0_9, %c0_10] : memref<1x40xf32, #tpu.memory_space<vmem>>, vector<1x40xf32>
    %13 = vector.broadcast %12 : vector<1x40xf32> to vector<16x40xf32>
    %14 = arith.addf %11, %13 : vector<16x40xf32>
    %cst_11 = arith.constant 0.000000e+00 : f32
    %15 = vector.broadcast %cst_11 : f32 to vector<16x40xf32>
    %16 = arith.maximumf %14, %15 : vector<16x40xf32>
    %17 = arith.truncf %16 : vector<16x40xf32> to vector<16x40xbf16>
    %c0_12 = arith.constant 0 : index
    %c0_13 = arith.constant 0 : index
    %18 = vector.load %arg6[%c0_12, %c0_13] : memref<40x4xbf16, #tpu.memory_space<vmem>>, vector<40x4xbf16>
    %cst_14 = arith.constant dense<0.000000e+00> : vector<16x4xf32>
    %19 = tpu.matmul %17, %18, %cst_14 {dimension_numbers = #tpu.dot_dimension_numbers<[1], [0], [0], [1], [0, 0, 1, 1], [], []>} : vector<16x40xbf16>, vector<40x4xbf16>, vector<16x4xf32> -> vector<16x4xf32>
    %c0_15 = arith.constant 0 : index
    %c0_16 = arith.constant 0 : index
    %20 = vector.load %arg7[%c0_15, %c0_16] : memref<1x4xf32, #tpu.memory_space<vmem>>, vector<1x4xf32>
    %21 = vector.broadcast %20 : vector<1x4xf32> to vector<16x4xf32>
    %22 = arith.addf %19, %21 : vector<16x4xf32>
    %c0_17 = arith.constant 0 : index
    %c0_18 = arith.constant 0 : index
    %23 = vector.load %arg8[%c0_17, %c0_18] : memref<16x4xf32, #tpu.memory_space<vmem>>, vector<16x4xf32>
    tpu.vector_store %arg8[%c0_17, %c0_18], %22 {strides = array<i32>} : memref<16x4xf32, #tpu.memory_space<vmem>>, vector<16x4xf32>,
    return
  }
  func.func @transform_0(%arg0: i32) -> (i32, i32) {
    %c0_i32 = arith.constant 0 : i32
    %c0_i32_0 = arith.constant 0 : i32
    return %arg0, %c0_i32 : i32, i32
  }
  func.func @transform_1(%arg0: i32) -> (i32, i32) {
    %c0_i32 = arith.constant 0 : i32
    %c0_i32_0 = arith.constant 0 : i32
    %c0_i32_1 = arith.constant 0 : i32
    return %c0_i32, %c0_i32_0 : i32, i32
  }
  func.func @transform_2(%arg0: i32) -> (i32, i32) {
    %c0_i32 = arith.constant 0 : i32
    %c0_i32_0 = arith.constant 0 : i32
    %c0_i32_1 = arith.constant 0 : i32
    return %c0_i32, %c0_i32_0 : i32, i32
  }
  func.func @transform_3(%arg0: i32) -> (i32, i32) {
    %c0_i32 = arith.constant 0 : i32
    %c0_i32_0 = arith.constant 0 : i32
    %c0_i32_1 = arith.constant 0 : i32
    return %c0_i32, %c0_i32_0 : i32, i32
  }
  func.func @transform_4(%arg0: i32) -> (i32, i32) {
    %c0_i32 = arith.constant 0 : i32
    %c0_i32_0 = arith.constant 0 : i32
    %c0_i32_1 = arith.constant 0 : i32
    return %c0_i32, %c0_i32_0 : i32, i32
  }
  func.func @transform_5(%arg0: i32) -> (i32, i32) {
    %c0_i32 = arith.constant 0 : i32
    %c0_i32_0 = arith.constant 0 : i32
    %c0_i32_1 = arith.constant 0 : i32
    return %c0_i32, %c0_i32_0 : i32, i32
  }
  func.func @transform_6(%arg0: i32) -> (i32, i32) {
    %c0_i32 = arith.constant 0 : i32
    %c0_i32_0 = arith.constant 0 : i32
    %c0_i32_1 = arith.constant 0 : i32
    return %c0_i32, %c0_i32_0 : i32, i32
  }
  func.func @transform_7(%arg0: i32) -> (i32, i32) {
    %c0_i32 = arith.constant 0 : i32
    %c0_i32_0 = arith.constant 0 : i32
    return %arg0, %c0_i32 : i32, i32
  }
}

</mosaic_0001>

<bundles_post_ra>
// kernel: tpu_custom_call.1
= control target key start
LH: loop header
LB: loop body
LE: loop exit
PB: predicated region body
PF: predicated region fallthrough
CT: control target
= control target key end

     0   :  { %s802_s24 = smov 0   ;;  %s905_s0 = inlined_call_operand.vmem [shape: f32[64,128], index: 0, kind: input, shape index: {}]   ;;  %s906_s1 = inlined_call_operand.vmem [shape: bf16[128,80], index: 1, kind: input, shape index: {}]   ;;  %s907_s2 = inlined_call_operand.vmem [shape: f32[1,80], index: 2, kind: input, shape index: {}]   ;;  %s908_s3 = inlined_call_operand.vmem [shape: bf16[80,40], index: 3, kind: input, shape index: {}]   ;;  %s909_s4 = inlined_call_operand.vmem [shape: f32[1,40], index: 4, kind: input, shape index: {}]   ;;  %s910_s5 = inlined_call_operand.vmem [shape: bf16[40,4], index: 5, kind: input, shape index: {}]   ;;  %s911_s6 = inlined_call_operand.vmem [shape: f32[1,4], index: 6, kind: input, shape index: {}]   ;;  %s912_s7 = inlined_call_operand.vmem [shape: f32[64,4], index: 7, kind: output, shape index: {}]  }
   0x1 LB: > { %s631_s25 = sadd.s32 4294967295, %s758_s24   ;;  %p635_p0 = scmp.ge.s32.totalorder %s758_s24, 1  ;;  %s758_s24 = sphi %s802_s24, %s17_s24  }
   0x2   : > { %p238_p1 = scmp.lt.s32.totalorder %s758_s24, 5 }
   0x4   : > { %p239_p2 = pnand %p635_p0, %p238_p1 }
   0x5   : > { %v736_v0 = vld [vmem:[%s906_s1] sm:$0xff] (!%p239_p2)   ;;  %v760_v1 = vmov (!%p239_p2), 0.0   ;;  %v737_v2 = vld [vmem:[%s906_s1 + $0x8] sm:$0xff] (!%p239_p2)   ;;  %vm761_vm0 = vmmov (!%p239_p2), 0   ;;  %v738_v3 = vld [vmem:[%s906_s1 + $0x10] sm:$0xff] (!%p239_p2)   ;;  %s636_s9 = sshll.u32 (!%p239_p2), %s631_s25, 1 }
   0x6   : > { %242 = sbr.rel (%p239_p2) target bundleno = 695 (0x2b7), region = 48  ;;  %682 = vmatprep.subr.bf16.mxu0 (!%p239_p2), %v760_v1  ;;  %702 = vmatprep.subr.bf16.mxu1 (!%p239_p2), %v760_v1  ;;  %v744_v4 = vld [vmem:[%s908_s3] sm:$0xff] (!%p239_p2)   ;;  %v739_v5 = vld [vmem:[%s906_s1 + $0x18] sm:$0xff] (!%p239_p2)   ;;  %v745_v6 = vld [vmem:[%s908_s3 + $0x8] sm:$0xff] (!%p239_p2)   ;;  %p271_p3 = scmp.lt.s32.totalorder (!%p239_p2), %s636_s9, 7  ;;  %vm448_vm1 = vcmask (!%p239_p2), 654336  }
   0x7   : > { %683 = vmatpush3.bf16.msra.mxu0 (!%p239_p2), %v736_v0  ;;  %698 = vmatprep.mubr.msk.bf16.mxu0 (!%p239_p2), %vm761_vm0, %v760_v1  ;;  %v740_v7 = vld [vmem:[%s906_s1 + $0x20] sm:$0xff] (!%p239_p2)   ;;  %v746_v8 = vld [vmem:[%s908_s3 + $0x10] sm:$0xff] (!%p239_p2)   ;;  %v741_v9 = vld [vmem:[%s906_s1 + $0x28] sm:$0xff] (!%p239_p2)   ;;  %vm527_vm2 = vcmask (!%p239_p2), 1043456   ;;  %vm523_vm3 = vcmask (!%p239_p2), 326656   ;;  %vm572_vm4 = vcmask (!%p239_p2), 31744  }
   0x8   : > { %684 = vmatprep.subr.bf16.mxu0 (!%p239_p2), %v760_v1  ;;  %712 = vmatprep.mubr.msk.bf16.mxu1 (!%p239_p2), %vm761_vm0, %v760_v1  ;;  %v742_v10 = vld [vmem:[%s906_s1 + $0x30] sm:$0xff] (!%p239_p2)   ;;  %v743_v11 = vld [vmem:[%s906_s1 + $0x38] sm:$0xff] (!%p239_p2)   ;;  %v748_v16 = vld [vmem:[%s908_s3 + $0x20] sm:$0xff] (!%p239_p2)  }
   0x9   : > { %703 = vmatpush3.bf16.msra.mxu1 (!%p239_p2), %v744_v4  ;;  %v747_v15 = vld [vmem:[%s908_s3 + $0x18] sm:$0xff] (!%p239_p2)   ;;  %v640_v17 = vld [vmem:[%s907_s2] ss:$0 sm:$0xff] (!%p239_p2)  ;;  %v750_v28 = vld [vmem:[%s910_s5 + $0x8] sm:$0xff] (!%p239_p2)  }
   0xa   : > { %704 = vmatprep.subr.bf16.mxu1 (!%p239_p2), %v760_v1  ;;  %v749_v26 = vld [vmem:[%s910_s5] sm:$0xff] (!%p239_p2)   ;;  %v751_v29 = vld [vmem:[%s910_s5 + $0x10] ss:$0 sps:$4 sm:$0xff] (!%p239_p2)  }
   0xb   : > { %685 = vmatpush3.bf16.msra.mxu0 (!%p239_p2), %v737_v2  ;;  %v529_v30 = vsel (!%p239_p2), %vm527_vm2, %v751_v29, 0  ;;  %v649_v31 = vld [vmem:[%s909_s4] ss:$0 sm:$0xff] (!%p239_p2) }
   0xc   : > { %686 = vmatprep.subr.bf16.mxu0 (!%p239_p2), %v760_v1  ;;  %v656_v41 = vld [vmem:[%s911_s6] ss:$0 sm:$0xff] (!%p239_p2) }
   0xd   : > { %705 = vmatpush3.bf16.msra.mxu1 %v745_v6  ;;  %s914_s9 = smov (!%p271_p3, %s636_s9), 7 }
   0xe   : > { %706 = vmatprep.subr.bf16.mxu1 %v760_v1  ;;  %s637_s22 = sshll.u32 %s914_s9, 3 }
   0xf   : > { %687 = vmatpush3.bf16.msra.mxu0 %v738_v3  ;;  %s274_s28 = scalar_lea.vmem %s905_s0, %s637_s22  ;;  %s280_s29 = scalar_lea.vmem %s912_s7, %s637_s22 }
  0x10   : > { %688 = vmatprep.subr.bf16.mxu0 %v760_v1  ;;  %v283_v12 = vld [vmem:[%s274_s28] sm:$0xff]  ;;  %v284_v13 = vld [vmem:[%s274_s28 + $0x8] sm:$0xff] }
  0x11   : > { %707 = vmatpush3.bf16.msra.mxu1 %v746_v8  ;;  %v285_v14 = vpack.c.bf16 %v284_v13, %v283_v12 }
  0x12   : > { %708 = vmatprep.subr.bf16.mxu1 %v760_v1 }
  0x13   : > { %689 = vmatpush3.bf16.msra.mxu0 %v739_v5 }
  0x14   : > { %690 = vmatprep.subr.bf16.mxu0 %v760_v1 }
  0x15   : > { %709 = vmatpush3.bf16.msra.mxu1 %v747_v15 }
  0x16   : > { %710 = vmatprep.subr.bf16.mxu1 %v760_v1 }
  0x17   : > { %691 = vmatpush3.bf16.msra.mxu0 %v740_v7 }
  0x18   : > { %692 = vmatprep.subr.bf16.mxu0 %v760_v1 }
  0x19   : > { %711 = vmatpush3.bf16.msra.mxu1 %v748_v16 }
  0x1a   : > { %716 = vmatprep.subr.bf16.mxu1 %v760_v1 }
  0x1b   : > { %693 = vmatpush3.bf16.msra.mxu0 %v741_v9 }
  0x1c   : > { %694 = vmatprep.subr.bf16.mxu0 %v760_v1 }
  0x1f   : > { %695 = vmatpush3.bf16.msra.mxu0 %v742_v10 }
  0x20   : > { %696 = vmatprep.subr.bf16.mxu0 %v760_v1 }
  0x23   : > { %697 = vmatpush3.bf16.msra.mxu0 %v743_v11 }
  0x26   : > { %699 = vmatmul.mubr.bf16.vlgmr.msra.gmra.mrb[0].mxu0 %v285_v14 }
  0xf9   : > { %v391_v18 = vpop.f32.mrb[0].mxu0 }
  0xfa   : > { %v392_v19 = vadd.f32 %v640_v17, %v391_v18  ;;  %v700_v20 = vpop.f32.mrb[1].mxu0 }
  0xfb   : > { %v394_v21 = vpop.f32.mrb[2].mxu0 }
  0xfc   : > { %v395_v22 = vadd.f32 %v640_v17, %v394_v21  ;;  %v701_v23 = vpop.f32.mrb[3].mxu0  ;;  %v398_v24 = vmax.f32 %v392_v19, 0.0 }
  0xfe   : > { %v399_v25 = vmax.f32 %v395_v22, 0.0 }
 0x100   : > { %v400_v27 = vpack.c.bf16 %v399_v25, %v398_v24 }
 0x102   : > { %713 = vmatmul.mubr.msk.bf16.vlgmr.msra.gmra.mrb[0].mxu1 %vm448_vm1, %v400_v27 }
 0x103   : > { %717 = vmatpush3.bf16.msra.mxu1 %v749_v26  ;;  %722 = vmatprep.mubr.msk.bf16.mxu1 %vm761_vm0, %v760_v1 }
 0x104   : > { %718 = vmatprep.subr.bf16.mxu1 %v760_v1 }
 0x107   : > { %719 = vmatpush3.bf16.msra.mxu1 %v750_v28 }
 0x108   : > { %720 = vmatprep.subr.bf16.mxu1 %v760_v1 }
 0x10b   : > { %721 = vmatpush3.bf16.msra.mxu1 %v529_v30 }
 0x1d5   : > { %v486_v32 = vpop.f32.mrb[0].mxu1 }
 0x1d6   : > { %v487_v33 = vadd.f32 %v649_v31, %v486_v32  ;;  %v714_v34 = vpop.f32.mrb[1].mxu1 }
 0x1d7   : > { %v489_v35 = vpop.f32.mrb[2].mxu1 }
 0x1d8   : > { %v490_v36 = vadd.f32 %v649_v31, %v489_v35  ;;  %v715_v37 = vpop.f32.mrb[3].mxu1  ;;  %v493_v38 = vmax.f32 %v487_v33, 0.0 }
 0x1da   : > { %v494_v39 = vmax.f32 %v490_v36, 0.0 }
 0x1dc   : > { %v495_v40 = vpack.c.bf16 %v494_v39, %v493_v38 }
 0x1de   : > { %723 = vmatmul.mubr.msk.bf16.vlgmr.msra.gmra.mrb[4].mxu1 %vm523_vm3, %v495_v40 }
 0x2b1   : > { %v565_v42 = vpop.f32.mrb[4].mxu1 }
 0x2b2   : > { %v566_v43 = vadd.f32 %v656_v41, %v565_v42  ;;  %v724_v44 = vpop.f32.mrb[5].mxu1 }
 0x2b3   : > { %v568_v45 = vpop.f32.mrb[6].mxu1 }
 0x2b4   : > { %573 = vst.msk [vmem:[%s280_s29] sm:$0xff] %vm572_vm4, %v566_v43  ;;  %v569_v46 = vadd.f32 %v656_v41, %v568_v45  ;;  %v725_v47 = vpop.f32.mrb[7].mxu1 }
 0x2b6   : > { %574 = vst.msk [vmem:[%s280_s29 + $0x8] sm:$0xff] %vm572_vm4, %v569_v46 }
 0x2b7 PF: > { %s17_s24 = sadd.s32 1, %s758_s24  }
 0x2b8   : > { %p14_p4 = scmp.ge.s32.totalorder %s17_s24, 6  }
 0x2ba   :  { %16 = sbr.rel (!%p14_p4) target bundleno = 1 (0x1), region = 78 }

</bundles_post_ra>
